<compile_context>
chip_gen: v7x
topology: tpu7x:2x2x1
jax: 0.10.0
libtpu: 0.0.40
codegen_flags: <defaults>
</compile_context>

<pallas_src>
import jax
import jax.numpy as jnp
from jax.experimental import pallas as pl
from jax.experimental.pallas import tpu as pltpu


def _actor_kernel(bounds_ref,        # SMEM (2,) f32: [log_std_min, log_std_max]
                  obs_ref,           # (TB, obs_dim)            streams
                  w0_ref, b0_ref,    # (obs_dim, H), (1, H)     resident
                  w1_ref, b1_ref,    # (H, H),       (1, H)     resident
                  w2_ref, b2_ref,    # (H, 2*Ap),    (1, 2*Ap)  resident, lane-padded
                  out_ref):          # (TB, 3*Ap) = [mu | std | tanh(mu)]
    mm_dtype = w0_ref.dtype

    # ---- trunk MLP (hidden_depth = 2): Linear -> ReLU -> Linear -> ReLU ----
    h = jnp.dot(obs_ref[...].astype(mm_dtype), w0_ref[...],
                preferred_element_type=jnp.float32)
    h = jnp.maximum(h + b0_ref[...], 0.0)
    h = jnp.dot(h.astype(mm_dtype), w1_ref[...],
                preferred_element_type=jnp.float32)
    h = jnp.maximum(h + b1_ref[...], 0.0)

    # ---- single fused head; chunk(2, dim=-1) at a 128-lane-aligned column ----
    head = jnp.dot(h.astype(mm_dtype), w2_ref[...],
                   preferred_element_type=jnp.float32) + b2_ref[...]
    ap = head.shape[-1] // 2          # multiple of 128 -> both slices are free
    mu = head[:, :ap]
    log_std = head[:, ap:]

    # ---- squash log_std into [log_std_min, log_std_max]; std = exp(log_std) ----
    lo = bounds_ref[0]
    hi = bounds_ref[1]
    log_std = jnp.tanh(log_std)
    log_std = lo + 0.5 * (hi - lo) * (log_std + 1.0)
    std = jnp.exp(log_std)

    # SquashedNormal.mean == tanh(loc). Three full-width lane-aligned stores.
    out_ref[:, :ap] = mu
    out_ref[:, ap:2 * ap] = std
    out_ref[:, 2 * ap:] = jnp.tanh(mu)


def prepare_actor_params(raw_params, *, param_dtype=jnp.bfloat16):
    """Pad the output head to a 128-lane boundary and cast weights ONCE.

    Call after init / each optimizer step and reuse for every forward pass;
    casting per call would re-read all f32 weights from HBM every step.
    Biases stay f32 (added after the f32 MXU accumulation). The padded weight
    columns / bias lanes are zero so the padded std lanes stay finite.
    """
    (w0, b0), (w1, b1), (w2, b2) = raw_params
    action_dim = w2.shape[1] // 2
    a_pad = ((action_dim + 127) // 128) * 128

    def pad_cols(x):
        return jnp.pad(x, ((0, 0), (0, a_pad - x.shape[1])))

    w2p = jnp.concatenate(
        [pad_cols(w2[:, :action_dim]), pad_cols(w2[:, action_dim:])], axis=1)
    b2p = jnp.concatenate(
        [pad_cols(b2[:, :action_dim]), pad_cols(b2[:, action_dim:])], axis=1)

    return dict(
        w0=w0.astype(param_dtype), b0=b0.astype(jnp.float32),
        w1=w1.astype(param_dtype), b1=b1.astype(jnp.float32),
        w2=w2p.astype(param_dtype), b2=b2p.astype(jnp.float32),
        action_dim=action_dim, a_pad=a_pad)


def diag_gaussian_actor(obs, prepared, log_std_bounds, *, block_b=256):
    """Fused actor forward. Returns (mu, std, squashed_mean = tanh(mu)).

    obs:      (B, obs_dim) f32; cast to the MXU operand dtype inside the
              kernel (no extra XLA cast op, obs traffic is negligible).
    prepared: output of prepare_actor_params (bf16 weights by default).
    block_b:  batch tile. ~256-512 on v6e, 128-256 on v5e; automatically
              reduced so B >= 256 gives >= 2 grid steps (v7x megacore).
    """
    w0, b0 = prepared["w0"], prepared["b0"]
    w1, b1 = prepared["w1"], prepared["b1"]
    w2, b2 = prepared["w2"], prepared["b2"]
    action_dim = prepared["action_dim"]
    a_pad = prepared["a_pad"]

    B, obs_dim = obs.shape
    hidden = w0.shape[1]
    bounds = jnp.asarray(log_std_bounds, dtype=jnp.float32)

    # Batch tile: big enough to amortize per-step overhead, small enough to
    # give both v7x TensorCores a grid step when the batch allows it.
    tb = min(block_b, B)
    if B >= 256 and pl.cdiv(B, tb) < 2:
        tb = pl.cdiv(B, 2)
    if tb != B and tb % 8 != 0:
        tb = ((tb + 7) // 8) * 8
    grid = (pl.cdiv(B, tb),)

    def resident(shape):
        # Constant index_map -> fetched once; single-buffer so the weights
        # don't occupy 2x VMEM (matters on v7x 64 MiB / v5e 16 MiB scoped).
        return pl.BlockSpec(shape, lambda i: (0, 0),
                            pipeline_mode=pl.Buffered(1))

    def nbytes(a):
        return a.size * a.dtype.itemsize

    cost = pl.CostEstimate(
        flops=2 * B * (obs_dim * hidden + hidden * hidden
                       + hidden * 2 * a_pad),
        transcendentals=3 * B * a_pad,           # tanh(log_std), exp, tanh(mu)
        bytes_accessed=(nbytes(obs) + nbytes(w0) + nbytes(b0)
                        + nbytes(w1) + nbytes(b1) + nbytes(w2) + nbytes(b2)
                        + B * 3 * a_pad * 4),
    )

    out = pl.pallas_call(
        _actor_kernel,
        grid=grid,
        out_shape=jax.ShapeDtypeStruct((B, 3 * a_pad), jnp.float32),
        in_specs=[
            pl.BlockSpec(memory_space=pltpu.MemorySpace.SMEM),  # log_std bounds
            pl.BlockSpec((tb, obs_dim), lambda i: (i, 0)),      # obs streams
            resident(w0.shape), resident(b0.shape),
            resident(w1.shape), resident(b1.shape),
            resident(w2.shape), resident(b2.shape),
        ],
        out_specs=pl.BlockSpec((tb, 3 * a_pad), lambda i: (i, 0)),
        compiler_params=pltpu.CompilerParams(
            dimension_semantics=("parallel",)),
        cost_estimate=cost,
    )(bounds, obs, w0, b0, w1, b1, w2, b2)

    mu = out[:, :action_dim]
    std = out[:, a_pad:a_pad + action_dim]
    pi_mean = out[:, 2 * a_pad:2 * a_pad + action_dim]
    return mu, std, pi_mean
    # TODO(synk): SquashedNormal sampling / log_prob (rsample + tanh Jacobian)
    # is distribution-object machinery outside the module's forward tensor math.


def init_params(key, obs_dim, hidden_dim, action_dim):
    """Deterministic synthetic weights (shapes match utils.mlp with depth=2).

    Weights are stored as (in, out); biases as (1, out) for lane broadcasting.
    """
    k0, k1, k2 = jax.random.split(key, 3)

    def lin(k, fan_in, fan_out):
        w = jax.random.normal(k, (fan_in, fan_out), jnp.float32) / jnp.sqrt(fan_in)
        b = jnp.zeros((1, fan_out), jnp.float32)
        return w, b

    return (
        lin(k0, obs_dim, hidden_dim),
        lin(k1, hidden_dim, hidden_dim),
        lin(k2, hidden_dim, 2 * action_dim),
    )


def actor_ref(obs, raw_params, log_std_bounds):
    """Plain-JAX reference of the same forward pass (unpadded f32 params)."""
    (w0, b0), (w1, b1), (w2, b2) = raw_params
    h = jnp.maximum(obs @ w0 + b0, 0.0)
    h = jnp.maximum(h @ w1 + b1, 0.0)
    out = h @ w2 + b2
    a = out.shape[-1] // 2
    mu, log_std = out[:, :a], out[:, a:]
    log_std = jnp.tanh(log_std)
    lo, hi = log_std_bounds
    log_std = lo + 0.5 * (hi - lo) * (log_std + 1.0)
    return mu, jnp.exp(log_std), jnp.tanh(mu)


if __name__ == "__main__":
    batch, obs_dim, hidden_dim, action_dim = 8, 24, 32, 2
    log_std_bounds = (-5.0, 2.0)

    key = jax.random.PRNGKey(0)
    k_obs, k_par = jax.random.split(key)
    obs = jax.random.normal(k_obs, (batch, obs_dim), jnp.float32)
    raw_params = init_params(k_par, obs_dim, hidden_dim, action_dim)

    mu_r, std_r, pm_r = actor_ref(obs, raw_params, log_std_bounds)

    # f32 MXU path: tight match against the plain-JAX reference.
    p32 = prepare_actor_params(raw_params, param_dtype=jnp.float32)
    mu, std, pi_mean = diag_gaussian_actor(obs, p32, log_std_bounds)
    jax.block_until_ready((mu, std, pi_mean))
    assert jnp.allclose(mu, mu_r, atol=1e-5), "f32 mu mismatch"
    assert jnp.allclose(std, std_r, atol=1e-5), "f32 std mismatch"
    assert jnp.allclose(pi_mean, pm_r, atol=1e-5), "f32 mean mismatch"

    # bf16 MXU-operand path (default; recommended on v6e / v7x): loose
    # tolerance vs the f32 reference so accuracy regressions are caught.
    pbf = prepare_actor_params(raw_params)            # bf16 weights, padded
    mu_b, std_b, pm_b = diag_gaussian_actor(obs, pbf, log_std_bounds)
    jax.block_until_ready((mu_b, std_b, pm_b))
    assert jnp.allclose(mu_b, mu_r, rtol=5e-2, atol=5e-2), "bf16 mu drift"
    assert jnp.allclose(std_b, std_r, rtol=5e-2, atol=5e-2), "bf16 std drift"
    assert jnp.allclose(pm_b, pm_r, rtol=5e-2, atol=5e-2), "bf16 mean drift"

    print("KERNEL_OK")
</pallas_src>

<mosaic_0001>
module attributes {stable_mosaic.version = 11 : i64} {
  func.func @_actor_kernel(%arg0: i32, %arg1: memref<2xf32, #tpu.memory_space<smem>>, %arg2: memref<8x24xf32, #tpu.memory_space<vmem>>, %arg3: memref<24x32xf32, #tpu.memory_space<vmem>>, %arg4: memref<1x32xf32, #tpu.memory_space<vmem>>, %arg5: memref<32x32xf32, #tpu.memory_space<vmem>>, %arg6: memref<1x32xf32, #tpu.memory_space<vmem>>, %arg7: memref<32x256xf32, #tpu.memory_space<vmem>>, %arg8: memref<1x256xf32, #tpu.memory_space<vmem>>, %arg9: memref<8x384xf32, #tpu.memory_space<vmem>>) attributes {dimension_semantics = [#tpu.dimension_semantics<parallel>], iteration_bounds = array<i64: 1>, scalar_prefetch = 0 : i64, scratch_operands = 0 : i64, tpu.core_type = #tpu.core_type<tc>, window_params = [{transform_indices = @transform_0, window_bounds = array<i64: 2>}, {transform_indices = @transform_1, window_bounds = array<i64: 8, 24>}, {pipeline_mode = #tpu.pipeline_mode<synchronous>, transform_indices = @transform_2, window_bounds = array<i64: 24, 32>}, {pipeline_mode = #tpu.pipeline_mode<synchronous>, transform_indices = @transform_3, window_bounds = array<i64: 1, 32>}, {pipeline_mode = #tpu.pipeline_mode<synchronous>, transform_indices = @transform_4, window_bounds = array<i64: 32, 32>}, {pipeline_mode = #tpu.pipeline_mode<synchronous>, transform_indices = @transform_5, window_bounds = array<i64: 1, 32>}, {pipeline_mode = #tpu.pipeline_mode<synchronous>, transform_indices = @transform_6, window_bounds = array<i64: 32, 256>}, {pipeline_mode = #tpu.pipeline_mode<synchronous>, transform_indices = @transform_7, window_bounds = array<i64: 1, 256>}, {transform_indices = @transform_8, window_bounds = array<i64: 8, 384>}]} {
    %c0 = arith.constant 0 : index
    %c0_0 = arith.constant 0 : index
    %0 = vector.load %arg2[%c0, %c0_0] : memref<8x24xf32, #tpu.memory_space<vmem>>, vector<8x24xf32>
    %c0_1 = arith.constant 0 : index
    %c0_2 = arith.constant 0 : index
    %1 = vector.load %arg3[%c0_1, %c0_2] : memref<24x32xf32, #tpu.memory_space<vmem>>, vector<24x32xf32>
    %cst = arith.constant dense<0.000000e+00> : vector<8x32xf32>
    %2 = tpu.matmul %0, %1, %cst {dimension_numbers = #tpu.dot_dimension_numbers<[1], [0], [0], [1], [0, 0, 1, 1], [], []>} : vector<8x24xf32>, vector<24x32xf32>, vector<8x32xf32> -> vector<8x32xf32>
    %c0_3 = arith.constant 0 : index
    %c0_4 = arith.constant 0 : index
    %3 = vector.load %arg4[%c0_3, %c0_4] : memref<1x32xf32, #tpu.memory_space<vmem>>, vector<1x32xf32>
    %4 = vector.broadcast %3 : vector<1x32xf32> to vector<8x32xf32>
    %5 = arith.addf %2, %4 : vector<8x32xf32>
    %cst_5 = arith.constant 0.000000e+00 : f32
    %6 = vector.broadcast %cst_5 : f32 to vector<8x32xf32>
    %7 = arith.maximumf %5, %6 : vector<8x32xf32>
    %c0_6 = arith.constant 0 : index
    %c0_7 = arith.constant 0 : index
    %8 = vector.load %arg5[%c0_6, %c0_7] : memref<32x32xf32, #tpu.memory_space<vmem>>, vector<32x32xf32>
    %cst_8 = arith.constant dense<0.000000e+00> : vector<8x32xf32>
    %9 = tpu.matmul %7, %8, %cst_8 {dimension_numbers = #tpu.dot_dimension_numbers<[1], [0], [0], [1], [0, 0, 1, 1], [], []>} : vector<8x32xf32>, vector<32x32xf32>, vector<8x32xf32> -> vector<8x32xf32>
    %c0_9 = arith.constant 0 : index
    %c0_10 = arith.constant 0 : index
    %10 = vector.load %arg6[%c0_9, %c0_10] : memref<1x32xf32, #tpu.memory_space<vmem>>, vector<1x32xf32>
    %11 = vector.broadcast %10 : vector<1x32xf32> to vector<8x32xf32>
    %12 = arith.addf %9, %11 : vector<8x32xf32>
    %cst_11 = arith.constant 0.000000e+00 : f32
    %13 = vector.broadcast %cst_11 : f32 to vector<8x32xf32>
    %14 = arith.maximumf %12, %13 : vector<8x32xf32>
    %c0_12 = arith.constant 0 : index
    %c0_13 = arith.constant 0 : index
    %15 = vector.load %arg7[%c0_12, %c0_13] : memref<32x256xf32, #tpu.memory_space<vmem>>, vector<32x256xf32>
    %cst_14 = arith.constant dense<0.000000e+00> : vector<8x256xf32>
    %16 = tpu.matmul %14, %15, %cst_14 {dimension_numbers = #tpu.dot_dimension_numbers<[1], [0], [0], [1], [0, 0, 1, 1], [], []>} : vector<8x32xf32>, vector<32x256xf32>, vector<8x256xf32> -> vector<8x256xf32>
    %c0_15 = arith.constant 0 : index
    %c0_16 = arith.constant 0 : index
    %17 = vector.load %arg8[%c0_15, %c0_16] : memref<1x256xf32, #tpu.memory_space<vmem>>, vector<1x256xf32>
    %18 = vector.broadcast %17 : vector<1x256xf32> to vector<8x256xf32>
    %19 = arith.addf %16, %18 : vector<8x256xf32>
    %20 = vector.extract_strided_slice %19 {offsets = [0, 0], sizes = [8, 128], strides = [1, 1]} : vector<8x256xf32> to vector<8x128xf32>
    %21 = vector.extract_strided_slice %19 {offsets = [0, 128], sizes = [8, 128], strides = [1, 1]} : vector<8x256xf32> to vector<8x128xf32>
    %c0_17 = arith.constant 0 : index
    %22 = memref.load %arg1[%c0_17] : memref<2xf32, #tpu.memory_space<smem>>
    %c1 = arith.constant 1 : index
    %23 = memref.load %arg1[%c1] : memref<2xf32, #tpu.memory_space<smem>>
    %24 = math.tanh %21 : vector<8x128xf32>
    %25 = arith.subf %23, %22 : f32
    %cst_18 = arith.constant 5.000000e-01 : f32
    %26 = arith.mulf %cst_18, %25 : f32
    %cst_19 = arith.constant 1.000000e+00 : f32
    %27 = vector.broadcast %cst_19 : f32 to vector<8x128xf32>
    %28 = arith.addf %24, %27 : vector<8x128xf32>
    %29 = vector.broadcast %26 : f32 to vector<8x128xf32>
    %30 = arith.mulf %29, %28 : vector<8x128xf32>
    %31 = vector.broadcast %22 : f32 to vector<8x128xf32>
    %32 = arith.addf %31, %30 : vector<8x128xf32>
    %33 = math.exp %32 : vector<8x128xf32>
    %c0_20 = arith.constant 0 : index
    %c0_21 = arith.constant 0 : index
    %34 = vector.load %arg9[%c0_20, %c0_21] : memref<8x384xf32, #tpu.memory_space<vmem>>, vector<8x128xf32>
    tpu.vector_store %arg9[%c0_20, %c0_21], %20 {strides = array<i32>} : memref<8x384xf32, #tpu.memory_space<vmem>>, vector<8x128xf32>,
    %c0_22 = arith.constant 0 : index
    %c128 = arith.constant 128 : index
    %35 = vector.load %arg9[%c0_22, %c128] : memref<8x384xf32, #tpu.memory_space<vmem>>, vector<8x128xf32>
    tpu.vector_store %arg9[%c0_22, %c128], %33 {strides = array<i32>} : memref<8x384xf32, #tpu.memory_space<vmem>>, vector<8x128xf32>,
    %36 = math.tanh %20 : vector<8x128xf32>
    %c0_23 = arith.constant 0 : index
    %c256 = arith.constant 256 : index
    %37 = vector.load %arg9[%c0_23, %c256] : memref<8x384xf32, #tpu.memory_space<vmem>>, vector<8x128xf32>
    tpu.vector_store %arg9[%c0_23, %c256], %36 {strides = array<i32>} : memref<8x384xf32, #tpu.memory_space<vmem>>, vector<8x128xf32>,
    return
  }
  func.func @transform_0(%arg0: i32) -> i32 {
    %c0_i32 = arith.constant 0 : i32
    %c0_i32_0 = arith.constant 0 : i32
    return %c0_i32 : i32
  }
  func.func @transform_1(%arg0: i32) -> (i32, i32) {
    %c0_i32 = arith.constant 0 : i32
    %c0_i32_0 = arith.constant 0 : i32
    return %arg0, %c0_i32 : i32, i32
  }
  func.func @transform_2(%arg0: i32) -> (i32, i32) {
    %c0_i32 = arith.constant 0 : i32
    %c0_i32_0 = arith.constant 0 : i32
    %c0_i32_1 = arith.constant 0 : i32
    return %c0_i32, %c0_i32_0 : i32, i32
  }
  func.func @transform_3(%arg0: i32) -> (i32, i32) {
    %c0_i32 = arith.constant 0 : i32
    %c0_i32_0 = arith.constant 0 : i32
    %c0_i32_1 = arith.constant 0 : i32
    return %c0_i32, %c0_i32_0 : i32, i32
  }
  func.func @transform_4(%arg0: i32) -> (i32, i32) {
    %c0_i32 = arith.constant 0 : i32
    %c0_i32_0 = arith.constant 0 : i32
    %c0_i32_1 = arith.constant 0 : i32
    return %c0_i32, %c0_i32_0 : i32, i32
  }
  func.func @transform_5(%arg0: i32) -> (i32, i32) {
    %c0_i32 = arith.constant 0 : i32
    %c0_i32_0 = arith.constant 0 : i32
    %c0_i32_1 = arith.constant 0 : i32
    return %c0_i32, %c0_i32_0 : i32, i32
  }
  func.func @transform_6(%arg0: i32) -> (i32, i32) {
    %c0_i32 = arith.constant 0 : i32
    %c0_i32_0 = arith.constant 0 : i32
    %c0_i32_1 = arith.constant 0 : i32
    return %c0_i32, %c0_i32_0 : i32, i32
  }
  func.func @transform_7(%arg0: i32) -> (i32, i32) {
    %c0_i32 = arith.constant 0 : i32
    %c0_i32_0 = arith.constant 0 : i32
    %c0_i32_1 = arith.constant 0 : i32
    return %c0_i32, %c0_i32_0 : i32, i32
  }
  func.func @transform_8(%arg0: i32) -> (i32, i32) {
    %c0_i32 = arith.constant 0 : i32
    %c0_i32_0 = arith.constant 0 : i32
    return %arg0, %c0_i32 : i32, i32
  }
}

</mosaic_0001>

<bundles_post_ra>
// kernel: tpu_custom_call.1
= control target key start
LH: loop header
LB: loop body
LE: loop exit
PB: predicated region body
PF: predicated region fallthrough
CT: control target
= control target key end

     0   :  { %13 = vsyncpa [#allocation5], 0  ;;  %s749_s0 = inlined_call_operand.hbm [shape: f32[2], index: 0, kind: input, shape index: {}]   ;;  %s750_s1 = inlined_call_operand.hbm [shape: f32[8,24], index: 1, kind: input, shape index: {}]   ;;  %s751_s2 = inlined_call_operand.hbm [shape: f32[24,32], index: 2, kind: input, shape index: {}]   ;;  %s752_s3 = inlined_call_operand.vmem [shape: f32[1,32], index: 3, kind: input, shape index: {}]   ;;  %s753_s4 = inlined_call_operand.hbm [shape: f32[32,32], index: 4, kind: input, shape index: {}]   ;;  %s754_s5 = inlined_call_operand.vmem [shape: f32[1,32], index: 5, kind: input, shape index: {}]   ;;  %s755_s6 = inlined_call_operand.hbm [shape: f32[32,256], index: 6, kind: input, shape index: {}]   ;;  %s756_s7 = inlined_call_operand.vmem [shape: f32[1,256], index: 7, kind: input, shape index: {}]   ;;  %s757_s8 = inlined_call_operand.hbm [shape: f32[8,384], index: 8, kind: output, shape index: {}]  }
   0x1   :  { %14 = vsyncpa [#allocation3], 0 }
   0x2   :  { %15 = vsyncpa [#allocation8], 0 }
   0x3   :  { %16 = vsyncpa [#allocation11], 0 }
   0x4   :  { %17 = vsyncpa [#allocation4], 0  ;;  %s595_s27 = smov [#allocation7]   ;;  %s465_s9 = scalar_lea.hbm %s751_s2, 384 }
   0x5   :  { %s41_s28 = sshll.u32 %s595_s27, 4  ;;  %p466_p0 = scmp.ne.s32.totalorder %s751_s2, %s465_s9  ;;  %s42_s28 = int_to_ptr.vmem [resolvable:$true] %s41_s28 }
   0x6   :  { %p469_p1 = scmp.lt.u32.totalorder %s465_s9, %s751_s2 }
   0x8   :  { %p471_p2 = pnand %p469_p1, %p466_p0 }
   0xa   :  { %474 = shalt.err (!%p471_p2)
}
   0xb   :  { %s475_s14 = scalar_lea.vmem %s42_s28, 384  ;;  %p480_p4 = scmp.lt.s32.totalorder %s42_s28, %s42_s28 }
   0xc   :  { %p476_p3 = scmp.ne.s32.totalorder %s42_s28, %s475_s14  ;;  %p481_p5 = scmp.lt.s32.totalorder %s475_s14, %s475_s14 }
   0xe   :  { %p482_p6 = por %p481_p5, %p480_p4 }
  0x10   :  { %p483_p7 = pnand %p482_p6, %p476_p3 }
  0x12   :  { %486 = shalt.err (!%p483_p7)
}
  0x13   :  { %s596_s15 = smov 128   ;;  %s597_s16 = smov 8  }
  0x14   :  { %47 = dma.hbm_to_vmem [thread:$0]  %s751_s2, 384, %s42_s28, [#allocation8], %s596_s15, %s596_s15, %s597_s16  }
  0x15   :  { %s487_s21 = scalar_lea.hbm %s749_s0, 16 }
  0x16   :  { %p488_p8 = scmp.ne.s32.totalorder %s749_s0, %s487_s21  ;;  %p491_p9 = scmp.lt.u32.totalorder %s487_s21, %s749_s0 }
  0x18   :  { %p493_p10 = pnand %p491_p9, %p488_p8 }
  0x1a   :  { %496 = shalt.err (!%p493_p10)
}
  0x1b   :  { %s598_s26 = smov [#allocation2]   ;;  %s599_s2 = smov [#allocation6]  }
  0x1c   :  { %25 = dma.hbm_to_smem %s749_s0, 16, %s598_s26, [#allocation5]  }
  0x1d   :  { %s32_s28 = sshll.u32 %s599_s2, 4  ;;  %s600_s30 = smov [#allocation9]   ;;  %s33_s28 = int_to_ptr.vmem [resolvable:$true] %s32_s28 }
  0x1e   :  { %s55_s9 = sshll.u32 %s600_s30, 4  ;;  %s497_s12 = scalar_lea.hbm %s750_s1, 128  ;;  %s680_s9 = int_to_ptr.vmem [resolvable:$true] %s55_s9 }
  0x1f   :  { %p498_p11 = scmp.ne.s32.totalorder %s750_s1, %s497_s12  ;;  %p501_p12 = scmp.lt.u32.totalorder %s497_s12, %s750_s1 }
  0x21   :  { %p503_p13 = pnand %p501_p12, %p498_p11 }
  0x23   :  { %506 = shalt.err (!%p503_p13)
}
  0x24   :  { %s507_s0 = scalar_lea.vmem %s33_s28, 128  ;;  %p512_p1 = scmp.lt.s32.totalorder %s33_s28, %s33_s28 }
  0x25   :  { %p508_p0 = scmp.ne.s32.totalorder %s33_s28, %s507_s0  ;;  %p513_p2 = scmp.lt.s32.totalorder %s507_s0, %s507_s0 }
  0x27   :  { %p514_p3 = por %p513_p2, %p512_p1 }
  0x29   :  { %p515_p4 = pnand %p514_p3, %p508_p0 }
  0x2b   :  { %518 = shalt.err (!%p515_p4)
}
  0x2c   :  { %35 = dma.hbm_to_vmem [thread:$0]  %s750_s1, 128, %s33_s28, [#allocation3]  }
  0x2d   :  { %s519_s23 = scalar_lea.hbm %s753_s4, 512 }
  0x2e   :  { %p520_p5 = scmp.ne.s32.totalorder %s753_s4, %s519_s23  ;;  %p523_p6 = scmp.lt.u32.totalorder %s519_s23, %s753_s4 }
  0x30   :  { %p525_p7 = pnand %p523_p6, %p520_p5 }
  0x32   :  { %528 = shalt.err (!%p525_p7)
}
  0x33   :  { %s529_s29 = scalar_lea.vmem %s680_s9, 512  ;;  %p534_p9 = scmp.lt.s32.totalorder %s680_s9, %s680_s9 }
  0x34   :  { %p530_p8 = scmp.ne.s32.totalorder %s680_s9, %s529_s29  ;;  %p535_p10 = scmp.lt.s32.totalorder %s529_s29, %s529_s29 }
  0x36   :  { %p536_p11 = por %p535_p10, %p534_p9 }
  0x38   :  { %p537_p12 = pnand %p536_p11, %p530_p8 }
  0x3a   :  { %540 = shalt.err (!%p537_p12)
}
  0x3b   :  { %61 = dma.hbm_to_vmem [thread:$0]  %s753_s4, 512, %s680_s9, [#allocation8], %s596_s15, %s596_s15, %s597_s16  }
  0x3c   :  { %s601_s28 = smov [#allocation10]   ;;  %s541_s12 = scalar_lea.hbm %s755_s6, 1024 }
  0x3d   :  { %s69_s30 = sshll.u32 %s601_s28, 4  ;;  %p542_p13 = scmp.ne.s32.totalorder %s755_s6, %s541_s12  ;;  %s70_s30 = int_to_ptr.vmem [resolvable:$true] %s69_s30 }
  0x3e   :  { %p545_p0 = scmp.lt.u32.totalorder %s541_s12, %s755_s6 }
  0x40   :  { %p547_p1 = pnand %p545_p0, %p542_p13 }
  0x42   :  { %550 = shalt.err (!%p547_p1)
}
  0x43   :  { %s551_s0 = scalar_lea.vmem %s70_s30, 1024  ;;  %p556_p3 = scmp.lt.s32.totalorder %s70_s30, %s70_s30 }
  0x44   :  { %p552_p2 = scmp.ne.s32.totalorder %s70_s30, %s551_s0  ;;  %p557_p4 = scmp.lt.s32.totalorder %s551_s0, %s551_s0 }
  0x46   :  { %p558_p5 = por %p557_p4, %p556_p3 }
  0x48   :  { %p559_p6 = pnand %p558_p5, %p552_p2 }
  0x4a   :  { %562 = shalt.err (!%p559_p6)
}
  0x4b   :  { %s602_s4 = smov 256   ;;  %s603_s15 = smov 16  }
  0x4c   :  { %75 = dma.hbm_to_vmem [thread:$0]  %s755_s6, 1024, %s70_s30, [#allocation11], %s602_s4, %s602_s4, %s603_s15  }
  0x4d   :  { %585 = dma.done.wait [#allocation5], 16  }
  0x4e   :  { %586 = vsyncadd [#allocation5], 4294967280 }
  0x4f   :  { %587 = dma.done.wait [#allocation3], 128  }
  0x50   :  { %588 = vsyncadd [#allocation3], 4294967168 }
  0x51   :  { %589 = dma.done.wait [#allocation8], 896  }
  0x52   :  { %590 = vsyncadd [#allocation8], 4294966400 }
  0x53   :  { %591 = dma.done.wait [#allocation11], 1024  }
  0x54   :  { %592 = vsyncadd [#allocation11], 4294966272 }
  0x55   :  { %93 = sfence }
  0x56   :  { %v95_v0 = vld [vmem:[#allocation7] sm:$0xff]  ;;  %v96_v1 = vld [vmem:[#allocation7 + $0x8] sm:$0xff]  ;;  %v604_v2 = vmov 0.0|0.0   ;;  %vm605_vm0 = vmmov 0   ;;  %v606_v4 = vmov 0.0   ;;  %v180_v5 = vld [vmem:[#allocation9] sm:$0xff]  ;;  %v276_v35 = vlaneseq }
  0x57   :  { %429 = vmatprep.subr.bf16.mxu0 %v604_v2  ;;  %v430_v3 = vpack.c.bf16 %v96_v1, %v95_v0  ;;  %415 = vmatprep.mubr.msk.f32.mxu0 %vm605_vm0, %v606_v4  ;;  %v181_v6 = vld [vmem:[#allocation9 + $0x8] sm:$0xff]  ;;  %v97_v8 = vld [vmem:[#allocation7 + $0x10] sm:$0xff]  ;;  %v94_v9 = vld [vmem:[#allocation6] sm:$0xff]  ;;  %vm105_vm1 = vcmask 195584   ;;  %vm191_vm2 = vcmask 261120   ;;  %s360_s23 = sld [smem:[#allocation2]] }
  0x58   :  { %432 = vmatprep.subr.bf16.mxu1 %v604_v2  ;;  %v433_v7 = vpack.c.bf16 %v181_v6, %v180_v5  ;;  %426 = vmatprep.mubr.msk.f32.mxu1 %vm605_vm0, %v606_v4  ;;  %v182_v10 = vld [vmem:[#allocation9 + $0x10] sm:$0xff]  ;;  %v183_v11 = vld [vmem:[#allocation9 + $0x18] sm:$0xff]  ;;  %v267_v13 = vld [vmem:[#allocation10 + $0x8] sm:$0xff]  ;;  %v277_v36 = vshrl.u32 %v276_v35, 7  ;;  %s399_s24 = sld [smem:[#allocation2 + $0x1]] }
  0x59   :  { %431 = vmatpush3.bf16.msra.mxu0 %v430_v3  ;;  %v436_v12 = vpack.c.bf16 %v183_v11, %v182_v10  ;;  %v269_v14 = vld [vmem:[#allocation10 + $0x18] sm:$0xff]  ;;  %v266_v15 = vld [vmem:[#allocation10] sm:$0xff]  ;;  %v268_v17 = vld [vmem:[#allocation10 + $0x10] sm:$0xff] }
  0x5a   :  { %413 = vmatprep.subr.mxu0 %v606_v4  ;;  %434 = vmatpush3.bf16.msra.mxu1 %v433_v7  ;;  %v438_v16 = vpack.c.bf16 %v269_v14, %v267_v13  ;;  %v440_v18 = vpack.c.bf16 %v268_v17, %v266_v15  ;;  %v394_v19 = vld [vmem:[%s752_s3] ss:$0 sm:$0xff]  ;;  %v271_v24 = vld [vmem:[#allocation10 + $0x28] sm:$0xff]  ;;  %v270_v27 = vld [vmem:[#allocation10 + $0x20] sm:$0xff]  ;;  %v278_v37 = vsub.s32 0, %v277_v36  ;;  %v282_v39 = vsub.s32 1, %v277_v36 }
  0x5b   :  { %435 = vmatprep.subr.bf16.mxu1 %v604_v2  ;;  %v273_v25 = vld [vmem:[#allocation10 + $0x38] sm:$0xff]  ;;  %v272_v28 = vld [vmem:[#allocation10 + $0x30] sm:$0xff] }
  0x5c   :  { %v442_v26 = vpack.c.bf16 %v273_v25, %v271_v24  ;;  %v444_v29 = vpack.c.bf16 %v272_v28, %v270_v27  ;;  %v396_v30 = vld [vmem:[%s754_s5] ss:$0 sm:$0xff] }
  0x5d   :  { %414 = vmatpush3.msra.mxu0 %v97_v8  ;;  %v274_v38 = vld [vmem:[%s756_s7] sm:$0x3]  ;;  %v368_v50 = vstv %s360_s23  ;;  %s607_s7 = smov [#allocation12]  }
  0x5e   :  { %416 = vmatmul.mubr.msk.f32.vlgmr.msra.gmra.mrb[0].mxu0 %vm105_vm1, %v94_v9  ;;  %437 = vmatpush3.bf16.msra.mxu1 %v436_v12  ;;  %v279_v40 = vrot.slane %v274_v38, %v278_v37  ;;  %v283_v41 = vrot.slane %v274_v38, %v282_v39  ;;  %s363_s5 = ssub.f32 %s399_s24, %s360_s23  ;;  %s382_s26 = sshll.u32 %s607_s7, 4  ;;  %s383_s26 = int_to_ptr.vmem [resolvable:$true] %s382_s26 }
  0x5f   :  { %353 = vmatprep.mubr.f32.mxu0 %v606_v4  ;;  %439 = vmatprep.subr.bf16.mxu0 %v438_v16  ;;  %s563_s27 = scalar_lea.vmem %s383_s26, 384  ;;  %p568_p8 = scmp.lt.s32.totalorder %s383_s26, %s383_s26 }
  0x60   :  { %441 = vmatpush1.bf16.msra.mxu0 %v440_v18  ;;  %s364_s25 = smul.f32 0.5, %s363_s5  ;;  %p564_p7 = scmp.ne.s32.totalorder %s383_s26, %s563_s27 }
  0x61   :  { %443 = vmatprep.subr.bf16.mxu0 %v442_v26  ;;  %p569_p9 = scmp.lt.s32.totalorder %s563_s27, %s563_s27 }
  0x62   :  { %v366_v48 = vstv %s364_s25 }
  0x63   :  { %p570_p10 = por %p569_p9, %p568_p8 }
  0x64   :  { %445 = vmatpush1.bf16.msra.mxu0 %v444_v29 }
  0x65   :  { %p571_p11 = pnand %p570_p10, %p564_p7 }
 0x131   :  { %v175_v20 = vpop.f32.mrb[0].mxu0 }
 0x132   :  { %v176_v21 = vadd.f32 %v394_v19, %v175_v20  ;;  %v417_v22 = vpop.f32.mrb[1].mxu0 }
 0x134   :  { %v179_v23 = vmax.f32 %v176_v21, 0.0 }
 0x136   :  { %427 = vmatmul.mubr.msk.f32.vlgmr.msra.gmra.mrb[0].mxu1 %vm191_vm2, %v179_v23 }
 0x209   :  { %v261_v31 = vpop.f32.mrb[0].mxu1 }
 0x20a   :  { %v262_v32 = vadd.f32 %v396_v30, %v261_v31  ;;  %v428_v33 = vpop.f32.mrb[1].mxu1 }
 0x20c   :  { %v265_v34 = vmax.f32 %v262_v32, 0.0 }
 0x20e   :  { %398 = vmatmul.mubr.msk.f32.vlgmr.msra.gmra.mrb[2].mxu0 %vm191_vm2, %v265_v34 }
 0x2e1   :  { %v355_v42 = vpop.f32.mrb[2].mxu0 }
 0x2e2   :  { %v356_v43 = vadd.f32 %v355_v42, %v279_v40  ;;  %v357_v44 = vpop.f32.mrb[3].mxu0 }
 0x2e3   :  { %v358_v45 = vadd.f32 %v357_v44, %v283_v41 }
 0x2e4   :  { %372 = vst [vmem:[#allocation12] sm:$0xff] %v356_v43  ;;  %459 = vtanh.f32 %v356_v43 }
 0x2e5   :  { %461 = vtanh.f32 %v358_v45 }
 0x2ee   :  { %v460_v46 = vpop.eup %459 }
 0x2ef   :  { %v462_v47 = vpop.eup %461  ;;  %375 = vst [vmem:[#allocation12 + $0x10] sm:$0xff] %v460_v46 }
 0x2f0   :  { %v365_v49 = vadd.f32 1.0, %v462_v47 }
 0x2f2   :  { %v367_v51 = vmul.f32 %v366_v48, %v365_v49 }
 0x2f4   :  { %v369_v52 = vadd.f32 %v368_v50, %v367_v51 }
 0x2f6   :  { %v370_v53 = vmul.f32 1.442695, %v369_v52 }
 0x2f8   :  { %463 = vpow2.f32 %v370_v53 }
 0x302   :  { %v464_v54 = vpop.eup %463 }
 0x303   :  { %373 = vst [vmem:[#allocation12 + $0x8] sm:$0xff] %v464_v54 }
 0x304   :  { %574 = shalt.err (!%p571_p11)
}
 0x305   :  { %s575_s2 = scalar_lea.hbm %s757_s8, 384 }
 0x306   :  { %p576_p12 = scmp.ne.s32.totalorder %s757_s8, %s575_s2  ;;  %p579_p13 = scmp.lt.u32.totalorder %s575_s2, %s757_s8 }
 0x308   :  { %p581_p0 = pnand %p579_p13, %p576_p12 }
 0x30a   :  { %584 = shalt.err (!%p581_p0)
}
 0x30b   :  { %385 = dma.vmem_to_hbm [thread:$0]  %s383_s26, 384, %s757_s8, [#allocation4]  }
 0x30c   :  { %593 = dma.done.wait [#allocation4], 384  }
 0x30d   :  { %594 = vsyncadd [#allocation4], 4294966912 }
 0x30e   :  { %389 = vsyncpa [#allocation3], 1 }
 0x30f   :  { %390 = vsyncpa [#allocation8], 1 }
 0x310   :  { %391 = vsyncpa [#allocation11], 1 }
 0x311   :  { %392 = vsyncpa [#allocation4], 1 }
 0x312   :  { %393 = vsyncpa [#allocation5], 1 }

</bundles_post_ra>
